<compile_context>
chip_gen: v5e
topology: v5e:2x2
jax: 0.10.0
libtpu: 0.0.40
codegen_flags: <defaults>
</compile_context>

<pallas_src>
import functools
import math

import jax
import jax.numpy as jnp
from jax.experimental import pallas as pl
from jax.experimental.pallas import tpu as pltpu


def _round_up(n, m):
    return -(-n // m) * m


def make_mlp_kernel(num_layers, out_dim):
    """Kernel: whole MLP forward for one batch tile.

    refs layout: (x_ref, w0_ref, b0_ref, ..., w{L-1}_ref, b{L-1}_ref, out_ref)
      x_ref  : (TB, K0_pad)          zero-padded activation tile
      wi_ref : (Ki_pad, Ni_pad)      per-layer zero-padded weight (VMEM resident)
      bi_ref : (1, Ni_pad)           per-layer zero-padded bias   (VMEM resident)
      out_ref: (TB, N_last_pad)      lane-dense softmax probabilities
    """

    def kernel(*refs):
        x_ref = refs[0]
        out_ref = refs[-1]

        h = x_ref[...]                                       # f32 (TB, K0_pad)
        for i in range(num_layers):                          # static unrolled loop
            w = refs[1 + 2 * i][...]                         # (Ki_pad, Ni_pad)
            b = refs[2 + 2 * i][...]                         # (1, Ni_pad)
            h = jnp.dot(h, w, preferred_element_type=jnp.float32) + b
            if i < num_layers - 1:
                h = jnp.maximum(h, 0.0)                      # ReLU on hidden layers

        # Lane-dense softmax at the padded width: mask padded logit columns to
        # -inf (exp -> 0) instead of slicing, so the store stays full-width.
        col = jax.lax.broadcasted_iota(jnp.int32, h.shape, dimension=1)
        logits = jnp.where(col < out_dim, h, -jnp.inf)

        m = jnp.max(logits, axis=-1, keepdims=True)          # real max (out_dim >= 1)
        e = jnp.exp(logits - m)
        s = jnp.sum(e, axis=-1, keepdims=True)
        # Exact reciprocal keeps 1e-5 agreement; approx=True (EUP vrcp) is a
        # small win if the tolerance can be relaxed.
        out_ref[...] = (e * pl.reciprocal(s, approx=False)).astype(out_ref.dtype)

    return kernel


def pack_params(params):
    """Pad/pack PyTorch-style (W:(in,out), b:(out,)) params ONCE, outside the hot path.

    Each layer's N (output) dim is padded to a multiple of 128 (lane width);
    its K (input) dim matches the previous layer's padded width (input features
    padded to a multiple of 8).  Zero padding is exact through matmul/ReLU.
    Returns (w_pads, b_pads, out_dim).
    """
    d_in = params[0][0].shape[0]
    k_pad = _round_up(d_in, 8)
    w_pads, b_pads = [], []
    for w, b in params:
        k, n = w.shape
        n_pad = _round_up(n, 128)
        wp = jnp.zeros((k_pad, n_pad), jnp.float32).at[:k, :n].set(w.astype(jnp.float32))
        bp = jnp.zeros((1, n_pad), jnp.float32).at[0, :n].set(b.astype(jnp.float32))
        w_pads.append(wp)
        b_pads.append(bp)
        k_pad = n_pad
    return tuple(w_pads), tuple(b_pads), params[-1][0].shape[1]


def _pick_batch_tile(batch):
    """Per-step overhead is ~0.35us, so prefer one big tile; but keep >=2 grid
    steps when the batch allows so v7x megacore can split the batch axis."""
    if batch >= 256:
        return 128
    if batch >= 16:
        return _round_up(batch, 16) // 2     # even 2-step grid, TB multiple of 8
    return _round_up(max(batch, 8), 8)       # single tile for tiny batches


def _forward(x, w_pads, b_pads, *, out_dim, batch_tile=None):
    num_layers = len(w_pads)
    batch = x.shape[0]
    d_in_pad = w_pads[0].shape[0]
    n_last_pad = w_pads[-1].shape[1]

    TB = batch_tile if batch_tile is not None else _pick_batch_tile(batch)
    grid_b = -(-batch // TB)                  # ceil-div
    batch_pad = grid_b * TB

    # Pad batch rows / input features with zeros (padded rows discarded below).
    x32 = x.astype(jnp.float32)
    x32 = jnp.pad(x32, ((0, batch_pad - batch), (0, d_in_pad - x.shape[1])))

    kernel = make_mlp_kernel(num_layers, out_dim)

    # activation tile: new block per grid step -> pipelined.
    in_specs = [pl.BlockSpec((TB, d_in_pad), lambda i: (i, 0))]
    operands = [x32]
    for w, b in zip(w_pads, b_pads):
        # per-layer weights/biases: constant index_map -> fetched once, VMEM
        # resident across grid steps.
        # TODO(synk): for large hidden dims on v7x (64 MiB VMEM), single-buffer
        # these resident operands (pipeline_mode=pl.Buffered(1)) and set
        # vmem_limit_bytes explicitly.
        in_specs.append(pl.BlockSpec(w.shape, lambda i: (0, 0)))
        in_specs.append(pl.BlockSpec(b.shape, lambda i: (0, 0)))
        operands += [w, b]

    flops = 2 * batch_pad * sum(w.shape[0] * w.shape[1] for w in w_pads)
    bytes_accessed = 4 * (
        batch_pad * d_in_pad
        + sum(w.size + b.size for w, b in zip(w_pads, b_pads))
        + batch_pad * n_last_pad
    )
    cost = pl.CostEstimate(
        flops=flops,
        transcendentals=batch_pad * n_last_pad,   # exp in the softmax
        bytes_accessed=bytes_accessed,
    )

    out_pad = pl.pallas_call(
        kernel,
        grid=(grid_b,),
        in_specs=in_specs,
        out_specs=pl.BlockSpec((TB, n_last_pad), lambda i: (i, 0)),
        out_shape=jax.ShapeDtypeStruct((batch_pad, n_last_pad), x.dtype),
        compiler_params=pltpu.CompilerParams(
            # independent batch tiles: shard across TCs on v7x, no-op elsewhere
            dimension_semantics=("parallel",),
        ),
        cost_estimate=cost,
    )(*operands)

    # Drop padded batch rows and padded logit columns (inside jit -> fused slice).
    return out_pad[:batch, :out_dim]


# jit'ed entry point; params are packed once via pack_params and passed as pytrees.
rl_network_forward = jax.jit(_forward, static_argnames=("out_dim", "batch_tile"))


def init_params(key, sizes):
    """Deterministic init mimicking PyTorch nn.Linear: U(-1/sqrt(in), 1/sqrt(in))."""
    params = []
    for i in range(1, len(sizes)):
        fan_in, fan_out = sizes[i - 1], sizes[i]
        bound = 1.0 / math.sqrt(fan_in)
        key, kw, kb = jax.random.split(key, 3)
        w = jax.random.uniform(kw, (fan_in, fan_out), jnp.float32, -bound, bound)
        b = jax.random.uniform(kb, (fan_out,), jnp.float32, -bound, bound)
        params.append((w, b))
    return params


def reference_forward(x, params):
    """Pure-JAX reference for correctness checking."""
    h = x
    for i, (w, b) in enumerate(params):
        h = h @ w + b
        if i < len(params) - 1:
            h = jnp.maximum(h, 0.0)
    return jax.nn.softmax(h, axis=-1)


if __name__ == "__main__":
    key = jax.random.PRNGKey(0)
    sizes = (16, 32, 32, 8)   # RLNetwork(sizes): 3 linear layers
    batch = 128

    key, kx = jax.random.split(key)
    x = jax.random.normal(kx, (batch, sizes[0]), jnp.float32)
    params = init_params(key, sizes)

    # Pack/pad parameters ONCE (hoisted out of the per-call path).
    w_pads, b_pads, out_dim = pack_params(params)

    out = rl_network_forward(x, w_pads, b_pads, out_dim=out_dim)
    out = jax.block_until_ready(out)

    ref = reference_forward(x, params)
    assert out.shape == (batch, sizes[-1])
    assert jnp.allclose(out, ref, atol=1e-5, rtol=1e-5), "mismatch vs reference"
    assert jnp.allclose(jnp.sum(out, axis=-1), 1.0, atol=1e-5), "softmax rows must sum to 1"

    print("KERNEL_OK")
</pallas_src>

<mosaic_0001>
module attributes {stable_mosaic.version = 11 : i64} {
  func.func @kernel(%arg0: i32, %arg1: memref<64x16xf32, #tpu.memory_space<vmem>>, %arg2: memref<16x128xf32, #tpu.memory_space<vmem>>, %arg3: memref<1x128xf32, #tpu.memory_space<vmem>>, %arg4: memref<128x128xf32, #tpu.memory_space<vmem>>, %arg5: memref<1x128xf32, #tpu.memory_space<vmem>>, %arg6: memref<128x128xf32, #tpu.memory_space<vmem>>, %arg7: memref<1x128xf32, #tpu.memory_space<vmem>>, %arg8: memref<64x128xf32, #tpu.memory_space<vmem>>) attributes {dimension_semantics = [#tpu.dimension_semantics<parallel>], iteration_bounds = array<i64: 2>, scalar_prefetch = 0 : i64, scratch_operands = 0 : i64, tpu.core_type = #tpu.core_type<tc>, window_params = [{transform_indices = @transform_0, window_bounds = array<i64: 64, 16>}, {pipeline_mode = #tpu.pipeline_mode<synchronous>, transform_indices = @transform_1, window_bounds = array<i64: 16, 128>}, {pipeline_mode = #tpu.pipeline_mode<synchronous>, transform_indices = @transform_2, window_bounds = array<i64: 1, 128>}, {pipeline_mode = #tpu.pipeline_mode<synchronous>, transform_indices = @transform_3, window_bounds = array<i64: 128, 128>}, {pipeline_mode = #tpu.pipeline_mode<synchronous>, transform_indices = @transform_4, window_bounds = array<i64: 1, 128>}, {pipeline_mode = #tpu.pipeline_mode<synchronous>, transform_indices = @transform_5, window_bounds = array<i64: 128, 128>}, {pipeline_mode = #tpu.pipeline_mode<synchronous>, transform_indices = @transform_6, window_bounds = array<i64: 1, 128>}, {transform_indices = @transform_7, window_bounds = array<i64: 64, 128>}]} {
    %c0 = arith.constant 0 : index
    %c0_0 = arith.constant 0 : index
    %0 = vector.load %arg1[%c0, %c0_0] : memref<64x16xf32, #tpu.memory_space<vmem>>, vector<64x16xf32>
    %c0_1 = arith.constant 0 : index
    %c0_2 = arith.constant 0 : index
    %1 = vector.load %arg2[%c0_1, %c0_2] : memref<16x128xf32, #tpu.memory_space<vmem>>, vector<16x128xf32>
    %c0_3 = arith.constant 0 : index
    %c0_4 = arith.constant 0 : index
    %2 = vector.load %arg3[%c0_3, %c0_4] : memref<1x128xf32, #tpu.memory_space<vmem>>, vector<1x128xf32>
    %cst = arith.constant dense<0.000000e+00> : vector<64x128xf32>
    %3 = tpu.matmul %0, %1, %cst {dimension_numbers = #tpu.dot_dimension_numbers<[1], [0], [0], [1], [0, 0, 1, 1], [], []>} : vector<64x16xf32>, vector<16x128xf32>, vector<64x128xf32> -> vector<64x128xf32>
    %4 = vector.broadcast %2 : vector<1x128xf32> to vector<64x128xf32>
    %5 = arith.addf %3, %4 : vector<64x128xf32>
    %cst_5 = arith.constant 0.000000e+00 : f32
    %6 = vector.broadcast %cst_5 : f32 to vector<64x128xf32>
    %7 = arith.maximumf %5, %6 : vector<64x128xf32>
    %c0_6 = arith.constant 0 : index
    %c0_7 = arith.constant 0 : index
    %8 = vector.load %arg4[%c0_6, %c0_7] : memref<128x128xf32, #tpu.memory_space<vmem>>, vector<128x128xf32>
    %c0_8 = arith.constant 0 : index
    %c0_9 = arith.constant 0 : index
    %9 = vector.load %arg5[%c0_8, %c0_9] : memref<1x128xf32, #tpu.memory_space<vmem>>, vector<1x128xf32>
    %cst_10 = arith.constant dense<0.000000e+00> : vector<64x128xf32>
    %10 = tpu.matmul %7, %8, %cst_10 {dimension_numbers = #tpu.dot_dimension_numbers<[1], [0], [0], [1], [0, 0, 1, 1], [], []>} : vector<64x128xf32>, vector<128x128xf32>, vector<64x128xf32> -> vector<64x128xf32>
    %11 = vector.broadcast %9 : vector<1x128xf32> to vector<64x128xf32>
    %12 = arith.addf %10, %11 : vector<64x128xf32>
    %cst_11 = arith.constant 0.000000e+00 : f32
    %13 = vector.broadcast %cst_11 : f32 to vector<64x128xf32>
    %14 = arith.maximumf %12, %13 : vector<64x128xf32>
    %c0_12 = arith.constant 0 : index
    %c0_13 = arith.constant 0 : index
    %15 = vector.load %arg6[%c0_12, %c0_13] : memref<128x128xf32, #tpu.memory_space<vmem>>, vector<128x128xf32>
    %c0_14 = arith.constant 0 : index
    %c0_15 = arith.constant 0 : index
    %16 = vector.load %arg7[%c0_14, %c0_15] : memref<1x128xf32, #tpu.memory_space<vmem>>, vector<1x128xf32>
    %cst_16 = arith.constant dense<0.000000e+00> : vector<64x128xf32>
    %17 = tpu.matmul %14, %15, %cst_16 {dimension_numbers = #tpu.dot_dimension_numbers<[1], [0], [0], [1], [0, 0, 1, 1], [], []>} : vector<64x128xf32>, vector<128x128xf32>, vector<64x128xf32> -> vector<64x128xf32>
    %18 = vector.broadcast %16 : vector<1x128xf32> to vector<64x128xf32>
    %19 = arith.addf %17, %18 : vector<64x128xf32>
    %20 = tpu.iota {dimensions = array<i32: 1>} : vector<64x128xi32>
    %c8_i32 = arith.constant 8 : i32
    %21 = vector.broadcast %c8_i32 : i32 to vector<64x128xi32>
    %22 = arith.cmpi slt, %20, %21 : vector<64x128xi32>
    %cst_17 = arith.constant 0xFF800000 : f32
    %23 = vector.broadcast %cst_17 : f32 to vector<64x128xf32>
    %24 = arith.select %22, %19, %23 : vector<64x128xi1>, vector<64x128xf32>
    %cst_18 = arith.constant dense<0xFF800000> : vector<64xf32>
    %25 = vector.multi_reduction <maximumf>, %24, %cst_18 [1] : vector<64x128xf32> to vector<64xf32>
    %26 = vector.shape_cast %25 : vector<64xf32> to vector<64x1xf32>
    %27 = vector.broadcast %26 : vector<64x1xf32> to vector<64x128xf32>
    %28 = arith.subf %24, %27 : vector<64x128xf32>
    %29 = math.exp %28 : vector<64x128xf32>
    %cst_19 = arith.constant dense<0.000000e+00> : vector<64xf32>
    %30 = vector.multi_reduction <add>, %29, %cst_19 [1] : vector<64x128xf32> to vector<64xf32>
    %31 = vector.shape_cast %30 : vector<64xf32> to vector<64x1xf32>
    %32 = tpu.reciprocal %31 : vector<64x1xf32> -> vector<64x1xf32>
    %33 = vector.broadcast %32 : vector<64x1xf32> to vector<64x128xf32>
    %34 = arith.mulf %29, %33 : vector<64x128xf32>
    %c0_20 = arith.constant 0 : index
    %c0_21 = arith.constant 0 : index
    %35 = vector.load %arg8[%c0_20, %c0_21] : memref<64x128xf32, #tpu.memory_space<vmem>>, vector<64x128xf32>
    tpu.vector_store %arg8[%c0_20, %c0_21], %34 {strides = array<i32>} : memref<64x128xf32, #tpu.memory_space<vmem>>, vector<64x128xf32>,
    return
  }
  func.func @transform_0(%arg0: i32) -> (i32, i32) {
    %c0_i32 = arith.constant 0 : i32
    %c0_i32_0 = arith.constant 0 : i32
    return %arg0, %c0_i32 : i32, i32
  }
  func.func @transform_1(%arg0: i32) -> (i32, i32) {
    %c0_i32 = arith.constant 0 : i32
    %c0_i32_0 = arith.constant 0 : i32
    %c0_i32_1 = arith.constant 0 : i32
    return %c0_i32, %c0_i32_0 : i32, i32
  }
  func.func @transform_2(%arg0: i32) -> (i32, i32) {
    %c0_i32 = arith.constant 0 : i32
    %c0_i32_0 = arith.constant 0 : i32
    %c0_i32_1 = arith.constant 0 : i32
    return %c0_i32, %c0_i32_0 : i32, i32
  }
  func.func @transform_3(%arg0: i32) -> (i32, i32) {
    %c0_i32 = arith.constant 0 : i32
    %c0_i32_0 = arith.constant 0 : i32
    %c0_i32_1 = arith.constant 0 : i32
    return %c0_i32, %c0_i32_0 : i32, i32
  }
  func.func @transform_4(%arg0: i32) -> (i32, i32) {
    %c0_i32 = arith.constant 0 : i32
    %c0_i32_0 = arith.constant 0 : i32
    %c0_i32_1 = arith.constant 0 : i32
    return %c0_i32, %c0_i32_0 : i32, i32
  }
  func.func @transform_5(%arg0: i32) -> (i32, i32) {
    %c0_i32 = arith.constant 0 : i32
    %c0_i32_0 = arith.constant 0 : i32
    %c0_i32_1 = arith.constant 0 : i32
    return %c0_i32, %c0_i32_0 : i32, i32
  }
  func.func @transform_6(%arg0: i32) -> (i32, i32) {
    %c0_i32 = arith.constant 0 : i32
    %c0_i32_0 = arith.constant 0 : i32
    %c0_i32_1 = arith.constant 0 : i32
    return %c0_i32, %c0_i32_0 : i32, i32
  }
  func.func @transform_7(%arg0: i32) -> (i32, i32) {
    %c0_i32 = arith.constant 0 : i32
    %c0_i32_0 = arith.constant 0 : i32
    return %arg0, %c0_i32 : i32, i32
  }
}

</mosaic_0001>

<bundles_post_ra>
// kernel: _forward.1
= control target key start
LH: loop header
LB: loop body
LE: loop exit
PB: predicated region body
PF: predicated region fallthrough
CT: control target
= control target key end

     0   :  { %12 = vsyncpa [#allocation3], 0  ;;  %s974_s24 = smov 0   ;;  %s1142_s0 = inlined_call_operand.vmem [shape: f32[128,16], index: 0, kind: input, shape index: {}]   ;;  %s1143_s1 = inlined_call_operand.vmem [shape: f32[16,128], index: 1, kind: input, shape index: {}]   ;;  %s1144_s2 = inlined_call_operand.vmem [shape: f32[1,128], index: 2, kind: input, shape index: {}]   ;;  %s1145_s3 = inlined_call_operand.vmem [shape: f32[128,128], index: 3, kind: input, shape index: {}]   ;;  %s1146_s4 = inlined_call_operand.vmem [shape: f32[1,128], index: 4, kind: input, shape index: {}]   ;;  %s1147_s5 = inlined_call_operand.hbm [shape: f32[128,128], index: 5, kind: input, shape index: {}]   ;;  %s1148_s6 = inlined_call_operand.vmem [shape: f32[1,128], index: 6, kind: input, shape index: {}]   ;;  %s1149_s7 = inlined_call_operand.vmem [shape: f32[128,128], index: 7, kind: output, shape index: {}]  }
   0x1 LB: > { %s224_s27 = sshll.u32 %s1147_s5, 4  ;;  %s780_s28 = sadd.s32 4294967295, %s929_s24   ;;  %s929_s24 = sphi %s974_s24, %s18_s24   ;;  %s225_s27 = int_to_ptr.hbm [resolvable:$true] %s224_s27 }
   0x2   : > { %p782_p0 = scmp.ge.s32.totalorder %s929_s24, 1  ;;  %p201_p1 = scmp.lt.s32.totalorder %s929_s24, 3 }
   0x3   : > { %p841_p2 = scmp.eq.s32.totalorder %s780_s28, 0  ;;  %s931_s29 = smov [#allocation2]  }
   0x4   : > { %p202_p3 = pnand %p782_p0, %p201_p1  ;;  %s226_s30 = sshll.u32 %s931_s29, 4  ;;  %s227_s30 = int_to_ptr.vmem [resolvable:$true] %s226_s30 }
   0x5   : > { %s932_s8 = smov 128   ;;  %s933_s9 = smov 8  }
   0x6   : > { %p837_p4 = pneg %p202_p3  ;;  %254 = sbr.rel (%p202_p3) target bundleno = 739 (0x2e3), region = 48 }
   0x8   : > { %p838_p5 = pnand %p841_p2, %p837_p4 }
   0xa   : > { %840 = dma.hbm_to_vmem [thread:$0]  (!%p838_p5), %s225_s27, 2048, %s227_s30, [#allocation3], %s932_s8, %s932_s8, %s933_s9  }
   0xb   : > { %924 = dma.done.wait (%p841_p2), [#allocation3], 2048  }
   0xc   : > { %926 = vsyncadd (%p841_p2), [#allocation3], 4294965248  ;;  %s787_s10 = sshll.u32 %s780_s28, 3  ;;  %v308_v0 = vld [vmem:[%s1143_s1 + $0x8] sm:$0xff]  ;;  %v307_v1 = vld [vmem:[%s1143_s1] sm:$0xff]  ;;  %vm313_vm0 = vcmask 130048  }
   0xd   : > { %p288_p6 = scmp.lt.s32.totalorder %s787_s10, 15  ;;  %352 = vmatpush.msra.mxu0 %v308_v0  ;;  %v402_v6 = vld [vmem:[%s1145_s3 + $0x78] sm:$0xff]  ;;  %v401_v7 = vld [vmem:[%s1145_s3 + $0x70] sm:$0xff]  ;;  %v400_v8 = vld [vmem:[%s1145_s3 + $0x68] sm:$0xff] }
   0xe   : > { %407 = vmatpush.msra.mxu1 %v402_v6  ;;  %801 = vmatpush.msra.mxu3 %v402_v6  ;;  %v399_v9 = vld [vmem:[%s1145_s3 + $0x60] sm:$0xff]  ;;  %v398_v11 = vld [vmem:[%s1145_s3 + $0x58] sm:$0xff]  ;;  %v397_v12 = vld [vmem:[%s1145_s3 + $0x50] sm:$0xff] }
   0xf   : > { %s1151_s10 = smov (!%p288_p6, %s787_s10), 15  ;;  %353 = vmatpush.msra.mxu0 %v307_v1  ;;  %v396_v13 = vld [vmem:[%s1145_s3 + $0x48] sm:$0xff]  ;;  %v395_v14 = vld [vmem:[%s1145_s3 + $0x40] sm:$0xff]  ;;  %v394_v16 = vld [vmem:[%s1145_s3 + $0x38] sm:$0xff] }
  0x10   : > { %s788_s11 = sshll.u32 %s1151_s10, 3  ;;  %408 = vmatpush.msra.mxu1 %v401_v7  ;;  %802 = vmatpush.msra.mxu3 %v401_v7  ;;  %v393_v17 = vld [vmem:[%s1145_s3 + $0x30] sm:$0xff]  ;;  %v392_v18 = vld [vmem:[%s1145_s3 + $0x28] sm:$0xff]  ;;  %v391_v19 = vld [vmem:[%s1145_s3 + $0x20] sm:$0xff] }
  0x11   : > { %s993_s14 = scalar_lea.vmem %s1142_s0, %s788_s11  ;;  %v390_v21 = vld [vmem:[%s1145_s3 + $0x18] sm:$0xff]  ;;  %v389_v23 = vld [vmem:[%s1145_s3 + $0x10] sm:$0xff]  ;;  %v388_v24 = vld [vmem:[%s1145_s3 + $0x8] sm:$0xff]  ;;  %s1121_s20 = scalar_lea.vmem %s1149_s7, %s788_s11 }
  0x12   : > { %v299_v2 = vld [vmem:[%s993_s14] sm:$0xff]  ;;  %v300_v3 = vld [vmem:[%s993_s14 + $0x8] sm:$0xff]  ;;  %v301_v4 = vld [vmem:[%s993_s14 + $0x10] sm:$0xff]  ;;  %409 = vmatpush.msra.mxu1 %v400_v8  ;;  %803 = vmatpush.msra.mxu3 %v400_v8 }
  0x13   : > { %791 = vmatmul.msk.f32.vlgmr.msra.gmra.mxu0 %vm313_vm0, %v299_v2  ;;  %v302_v5 = vld [vmem:[%s993_s14 + $0x18] sm:$0xff]  ;;  %v303_v10 = vld [vmem:[%s993_s14 + $0x20] sm:$0xff]  ;;  %v304_v15 = vld [vmem:[%s993_s14 + $0x28] sm:$0xff] }
  0x14   : > { %410 = vmatpush.msra.mxu1 %v399_v9  ;;  %804 = vmatpush.msra.mxu3 %v399_v9  ;;  %v305_v20 = vld [vmem:[%s993_s14 + $0x30] sm:$0xff]  ;;  %v306_v22 = vld [vmem:[%s993_s14 + $0x38] sm:$0xff]  ;;  %v387_v25 = vld [vmem:[%s1145_s3] sm:$0xff] }
  0x15   : > { %v1068_v26 = vld [vmem:[%s1144_s2] ss:$0 sm:$0xff]  ;;  %v471_v39 = vld [vmem:[#allocation2 + $0x78] sm:$0xff]  ;;  %v470_v40 = vld [vmem:[#allocation2 + $0x70] sm:$0xff] }
  0x16   : > { %411 = vmatpush.msra.mxu1 %v398_v11  ;;  %805 = vmatpush.msra.mxu3 %v398_v11  ;;  %v469_v41 = vld [vmem:[#allocation2 + $0x68] sm:$0xff]  ;;  %v468_v44 = vld [vmem:[#allocation2 + $0x60] sm:$0xff]  ;;  %v467_v46 = vld [vmem:[#allocation2 + $0x58] sm:$0xff] }
  0x17   : > { %476 = vmatpush.msra.mxu2 %v471_v39  ;;  %v466_v47 = vld [vmem:[#allocation2 + $0x50] sm:$0xff]  ;;  %v465_v48 = vld [vmem:[#allocation2 + $0x48] sm:$0xff]  ;;  %v464_v51 = vld [vmem:[#allocation2 + $0x40] sm:$0xff] }
  0x18   : > { %412 = vmatpush.msra.mxu1 %v397_v12  ;;  %806 = vmatpush.msra.mxu3 %v397_v12  ;;  %v463_v53 = vld [vmem:[#allocation2 + $0x38] sm:$0xff]  ;;  %v462_v54 = vld [vmem:[#allocation2 + $0x30] sm:$0xff]  ;;  %v461_v55 = vld [vmem:[#allocation2 + $0x28] sm:$0xff] }
  0x19   : > { %477 = vmatpush.msra.mxu2 %v470_v40  ;;  %v460_v58 = vld [vmem:[#allocation2 + $0x20] sm:$0xff]  ;;  %v459_v60 = vld [vmem:[#allocation2 + $0x18] sm:$0xff]  ;;  %v458_v0 = vld [vmem:[#allocation2 + $0x10] sm:$0xff] }
  0x1a   : > { %413 = vmatpush.msra.mxu1 %v396_v13  ;;  %807 = vmatpush.msra.mxu3 %v396_v13  ;;  %v457_v1 = vld [vmem:[#allocation2 + $0x8] sm:$0xff]  ;;  %v456_v2 = vld [vmem:[#allocation2] sm:$0xff] }
  0x1b   : > { %792 = vmatmul.msk.f32.gmra.mxu0 %vm313_vm0, %v300_v3  ;;  %478 = vmatpush.msra.mxu2 %v469_v41  ;;  %v855_v3 = vld [vmem:[%s1146_s4] ss:$0 sm:$0xff] }
  0x1c   : > { %414 = vmatpush.msra.mxu1 %v395_v14  ;;  %808 = vmatpush.msra.mxu3 %v395_v14 }
  0x1d   : > { %479 = vmatpush.msra.mxu2 %v468_v44 }
  0x1e   : > { %415 = vmatpush.msra.mxu1 %v394_v16  ;;  %809 = vmatpush.msra.mxu3 %v394_v16 }
  0x1f   : > { %480 = vmatpush.msra.mxu2 %v467_v46 }
  0x20   : > { %416 = vmatpush.msra.mxu1 %v393_v17  ;;  %810 = vmatpush.msra.mxu3 %v393_v17 }
  0x21   : > { %481 = vmatpush.msra.mxu2 %v466_v47 }
  0x22   : > { %417 = vmatpush.msra.mxu1 %v392_v18  ;;  %811 = vmatpush.msra.mxu3 %v392_v18 }
  0x23   : > { %793 = vmatmul.msk.f32.gmra.mxu0 %vm313_vm0, %v301_v4  ;;  %482 = vmatpush.msra.mxu2 %v465_v48 }
  0x24   : > { %418 = vmatpush.msra.mxu1 %v391_v19  ;;  %812 = vmatpush.msra.mxu3 %v391_v19 }
  0x25   : > { %483 = vmatpush.msra.mxu2 %v464_v51 }
  0x26   : > { %419 = vmatpush.msra.mxu1 %v390_v21  ;;  %813 = vmatpush.msra.mxu3 %v390_v21 }
  0x27   : > { %484 = vmatpush.msra.mxu2 %v463_v53 }
  0x28   : > { %420 = vmatpush.msra.mxu1 %v389_v23  ;;  %814 = vmatpush.msra.mxu3 %v389_v23 }
  0x29   : > { %485 = vmatpush.msra.mxu2 %v462_v54 }
  0x2a   : > { %421 = vmatpush.msra.mxu1 %v388_v24  ;;  %815 = vmatpush.msra.mxu3 %v388_v24 }
  0x2b   : > { %794 = vmatmul.msk.f32.gmra.mxu0 %vm313_vm0, %v302_v5  ;;  %486 = vmatpush.msra.mxu2 %v461_v55 }
  0x2c   : > { %422 = vmatpush.msra.mxu1 %v387_v25  ;;  %816 = vmatpush.msra.mxu3 %v387_v25 }
  0x2d   : > { %487 = vmatpush.msra.mxu2 %v460_v58 }
  0x2e   : > { %817 = vmatpush.msrb.mxu3 %v471_v39 }
  0x2f   : > { %488 = vmatpush.msra.mxu2 %v459_v60 }
  0x30   : > { %818 = vmatpush.msrb.mxu3 %v470_v40 }
  0x31   : > { %489 = vmatpush.msra.mxu2 %v458_v0 }
  0x32   : > { %819 = vmatpush.msrb.mxu3 %v469_v41 }
  0x33   : > { %795 = vmatmul.msk.f32.gmra.mxu0 %vm313_vm0, %v303_v10  ;;  %490 = vmatpush.msra.mxu2 %v457_v1 }
  0x34   : > { %820 = vmatpush.msrb.mxu3 %v468_v44 }
  0x35   : > { %491 = vmatpush.msra.mxu2 %v456_v2 }
  0x36   : > { %821 = vmatpush.msrb.mxu3 %v467_v46 }
  0x38   : > { %822 = vmatpush.msrb.mxu3 %v466_v47 }
  0x3a   : > { %823 = vmatpush.msrb.mxu3 %v465_v48 }
  0x3b   : > { %796 = vmatmul.msk.f32.gmra.mxu0 %vm313_vm0, %v304_v15 }
  0x3c   : > { %824 = vmatpush.msrb.mxu3 %v464_v51 }
  0x3e   : > { %825 = vmatpush.msrb.mxu3 %v463_v53 }
  0x40   : > { %826 = vmatpush.msrb.mxu3 %v462_v54 }
  0x42   : > { %827 = vmatpush.msrb.mxu3 %v461_v55 }
  0x43   : > { %797 = vmatmul.msk.f32.gmra.mxu0 %vm313_vm0, %v305_v20 }
  0x44   : > { %828 = vmatpush.msrb.mxu3 %v460_v58 }
  0x46   : > { %829 = vmatpush.msrb.mxu3 %v459_v60 }
  0x48   : > { %830 = vmatpush.msrb.mxu3 %v458_v0 }
  0x4a   : > { %831 = vmatpush.msrb.mxu3 %v457_v1 }
  0x4b   : > { %798 = vmatmul.msk.f32.gmra.mxu0 %vm313_vm0, %v306_v22 }
  0x4c   : > { %832 = vmatpush.msrb.mxu3 %v456_v2 }
  0x90   : > { %v355_v27 = vpop.f32.mrf.mxu0 }
  0x91   : > { %v356_v28 = vadd.f32 %v1068_v26, %v355_v27 }
  0x93   : > { %v379_v29 = vmax.f32 %v356_v28, 0.0  ;;  %v517_v28 = vlaneseq }
  0x95   : > { %423 = vmatmul.f32.vlgmr.msra.gmra.mxu1 %v379_v29  ;;  %v518_v29 = vand.u32 127, %v517_v28 }
  0x97   : > { %vm519_vm1 = vcmp.lt.s32.totalorder %v518_v29, 8 }
  0x98   : > { %v358_v30 = vpop.f32.mrf.mxu0 }
  0x99   : > { %v359_v31 = vadd.f32 %v1068_v26, %v358_v30  ;;  %v856_v30 = vld [vmem:[%s1148_s6] ss:$0 sm:$0xff] }
  0x9b   : > { %v380_v32 = vmax.f32 %v359_v31, 0.0 }
  0x9d   : > { %426 = vmatmul.f32.gmra.mxu1 %v380_v32 }
  0xa0   : > { %v361_v33 = vpop.f32.mrf.mxu0 }
  0xa1   : > { %v362_v34 = vadd.f32 %v1068_v26, %v361_v33 }
  0xa3   : > { %v381_v35 = vmax.f32 %v362_v34, 0.0 }
  0xa5   : > { %429 = vmatmul.f32.gmra.mxu1 %v381_v35 }
  0xa8   : > { %v364_v36 = vpop.f32.mrf.mxu0 }
  0xa9   : > { %v365_v37 = vadd.f32 %v1068_v26, %v364_v36 }
  0xab   : > { %v382_v38 = vmax.f32 %v365_v37, 0.0 }
  0xad   : > { %432 = vmatmul.f32.gmra.mxu1 %v382_v38 }
  0xb0   : > { %v367_v42 = vpop.f32.mrf.mxu0 }
  0xb1   : > { %v368_v43 = vadd.f32 %v1068_v26, %v367_v42 }
  0xb3   : > { %v383_v45 = vmax.f32 %v368_v43, 0.0 }
  0xb5   : > { %435 = vmatmul.f32.gmra.mxu1 %v383_v45 }
  0xb8   : > { %v370_v49 = vpop.f32.mrf.mxu0 }
  0xb9   : > { %v371_v50 = vadd.f32 %v1068_v26, %v370_v49 }
  0xbb   : > { %v384_v52 = vmax.f32 %v371_v50, 0.0 }
  0xbd   : > { %438 = vmatmul.f32.gmra.mxu1 %v384_v52 }
  0xc0   : > { %v373_v56 = vpop.f32.mrf.mxu0 }
  0xc1   : > { %v374_v57 = vadd.f32 %v1068_v26, %v373_v56 }
  0xc3   : > { %v385_v59 = vmax.f32 %v374_v57, 0.0 }
  0xc5   : > { %441 = vmatmul.f32.vlgmr.msra.gmra.mxu3 %v385_v59 }
  0xc8   : > { %v376_v61 = vpop.f32.mrf.mxu0 }
  0xc9   : > { %v377_v62 = vadd.f32 %v1068_v26, %v376_v61 }
  0xcb   : > { %v386_v63 = vmax.f32 %v377_v62, 0.0 }
  0xcd   : > { %444 = vmatmul.f32.gmra.mxu3 %v386_v63 }
 0x112   : > { %v424_v4 = vpop.f32.mrf.mxu1 }
 0x113   : > { %v425_v5 = vadd.f32 %v855_v3, %v424_v4 }
 0x115   : > { %v448_v6 = vmax.f32 %v425_v5, 0.0 }
 0x117   : > { %492 = vmatmul.f32.vlgmr.msra.gmra.mxu2 %v448_v6 }
 0x11a   : > { %v427_v7 = vpop.f32.mrf.mxu1 }
 0x11b   : > { %v428_v8 = vadd.f32 %v855_v3, %v427_v7 }
 0x11d   : > { %v449_v9 = vmax.f32 %v428_v8, 0.0 }
 0x11f   : > { %495 = vmatmul.f32.gmra.mxu2 %v449_v9 }
 0x122   : > { %v430_v10 = vpop.f32.mrf.mxu1 }
 0x123   : > { %v431_v11 = vadd.f32 %v855_v3, %v430_v10 }
 0x125   : > { %v450_v12 = vmax.f32 %v431_v11, 0.0 }
 0x127   : > { %498 = vmatmul.f32.gmra.mxu2 %v450_v12 }
 0x12a   : > { %v433_v13 = vpop.f32.mrf.mxu1 }
 0x12b   : > { %v434_v14 = vadd.f32 %v855_v3, %v433_v13 }
 0x12d   : > { %v451_v15 = vmax.f32 %v434_v14, 0.0 }
 0x12f   : > { %501 = vmatmul.f32.gmra.mxu2 %v451_v15 }
 0x132   : > { %v436_v16 = vpop.f32.mrf.mxu1 }
 0x133   : > { %v437_v17 = vadd.f32 %v855_v3, %v436_v16 }
 0x135   : > { %v452_v18 = vmax.f32 %v437_v17, 0.0 }
 0x137   : > { %504 = vmatmul.f32.gmra.mxu2 %v452_v18 }
 0x13a   : > { %v439_v19 = vpop.f32.mrf.mxu1 }
 0x13b   : > { %v440_v20 = vadd.f32 %v855_v3, %v439_v19 }
 0x13d   : > { %v453_v21 = vmax.f32 %v440_v20, 0.0 }
 0x13f   : > { %507 = vmatmul.f32.gmra.mxu2 %v453_v21 }
 0x148   : > { %v442_v22 = vpop.f32.mrf.mxu3 }
 0x149   : > { %v443_v23 = vadd.f32 %v855_v3, %v442_v22 }
 0x14b   : > { %v454_v24 = vmax.f32 %v443_v23, 0.0 }
 0x14d   : > { %510 = vmatmul.f32.vlgmr.msrb.gmra.mxu3 %v454_v24 }
 0x150   : > { %v445_v25 = vpop.f32.mrf.mxu3 }
 0x151   : > { %v446_v26 = vadd.f32 %v855_v3, %v445_v25 }
 0x153   : > { %v455_v27 = vmax.f32 %v446_v26, 0.0 }
 0x155   : > { %513 = vmatmul.f32.gmra.mxu3 %v455_v27 }
 0x19a   : > { %v493_v31 = vpop.f32.mrf.mxu2 }
 0x19b   : > { %v494_v32 = vadd.f32 %v856_v30, %v493_v31 }
 0x19d   : > { %v520_v33 = vsel %vm519_vm1, %v494_v32, -inf }
 0x19e   : > { %528 = vmax.xlane.f32.xlu0 %v520_v33 }
 0x1a2   : > { %v496_v34 = vpop.f32.mrf.mxu2 }
 0x1a3   : > { %v497_v35 = vadd.f32 %v856_v30, %v496_v34 }
 0x1a5   : > { %v521_v36 = vsel %vm519_vm1, %v497_v35, -inf }
 0x1a6   : > { %530 = vmax.xlane.f32.xlu0 %v521_v36 }
 0x1aa   : > { %v499_v37 = vpop.f32.mrf.mxu2 }
 0x1ab   : > { %v500_v38 = vadd.f32 %v856_v30, %v499_v37 }
 0x1ad   : > { %v522_v39 = vsel %vm519_vm1, %v500_v38, -inf }
 0x1ae   : > { %532 = vmax.xlane.f32.xlu1 %v522_v39 }
 0x1b2   : > { %v502_v40 = vpop.f32.mrf.mxu2 }
 0x1b3   : > { %v503_v41 = vadd.f32 %v856_v30, %v502_v40 }
 0x1b5   : > { %v523_v42 = vsel %vm519_vm1, %v503_v41, -inf }
 0x1b6   : > { %534 = vmax.xlane.f32.xlu1 %v523_v42 }
 0x1ba   : > { %v505_v43 = vpop.f32.mrf.mxu2 }
 0x1bb   : > { %v506_v44 = vadd.f32 %v856_v30, %v505_v43 }
 0x1bd   : > { %v524_v45 = vsel %vm519_vm1, %v506_v44, -inf }
 0x1be   : > { %536 = vmax.xlane.f32.xlu2 %v524_v45 }
 0x1c2   : > { %v508_v46 = vpop.f32.mrf.mxu2 }
 0x1c3   : > { %v509_v47 = vadd.f32 %v856_v30, %v508_v46 }
 0x1c5   : > { %v525_v48 = vsel %vm519_vm1, %v509_v47, -inf }
 0x1c6   : > { %538 = vmax.xlane.f32.xlu2 %v525_v48 }
 0x1d0   : > { %v511_v49 = vpop.f32.mrf.mxu3 }
 0x1d1   : > { %v512_v50 = vadd.f32 %v856_v30, %v511_v49 }
 0x1d3   : > { %v526_v51 = vsel %vm519_vm1, %v512_v50, -inf }
 0x1d4   : > { %540 = vmax.xlane.f32.xlu0 %v526_v51 }
 0x1d8   : > { %v514_v52 = vpop.f32.mrf.mxu3 }
 0x1d9   : > { %v515_v53 = vadd.f32 %v856_v30, %v514_v52 }
 0x1db   : > { %v527_v54 = vsel %vm519_vm1, %v515_v53, -inf }
 0x1dc   : > { %542 = vmax.xlane.f32.xlu1 %v527_v54 }
 0x211   : > { %v529_v55 = vpop.xlane.xlu0 %528 }
 0x212   : > { %v544_v56 = vsub.f32 %v520_v33, %v529_v55 }
 0x214   : > { %v552_v57 = vmul.f32 1.442695, %v544_v56 }
 0x216   : > { %857 = vpow2.f32 %v552_v57 }
 0x219   : > { %v531_v58 = vpop.xlane.xlu0 %530 }
 0x21a   : > { %v545_v59 = vsub.f32 %v521_v36, %v531_v58 }
 0x21c   : > { %v1092_v60 = vpop.eup %857  ;;  %v554_v61 = vmul.f32 1.442695, %v545_v59 }
 0x21d   : > { %568 = vadd.xlane.f32.xlu2 %v1092_v60 }
 0x21e   : > { %859 = vpow2.f32 %v554_v61 }
 0x221   : > { %v533_v62 = vpop.xlane.xlu1 %532 }
 0x222   : > { %v546_v63 = vsub.f32 %v522_v39, %v533_v62 }
 0x224   : > { %v1095_v0 = vpop.eup %859  ;;  %v556_v1 = vmul.f32 1.442695, %v546_v63 }
 0x225   : > { %570 = vadd.xlane.f32.xlu0 %v1095_v0 }
 0x226   : > { %861 = vpow2.f32 %v556_v1 }
 0x229   : > { %v535_v2 = vpop.xlane.xlu1 %534 }
 0x22a   : > { %v547_v3 = vsub.f32 %v523_v42, %v535_v2 }
 0x22c   : > { %v1098_v4 = vpop.eup %861  ;;  %v558_v5 = vmul.f32 1.442695, %v547_v3 }
 0x22d   : > { %572 = vadd.xlane.f32.xlu1 %v1098_v4 }
 0x22e   : > { %863 = vpow2.f32 %v558_v5 }
 0x231   : > { %v537_v6 = vpop.xlane.xlu2 %536 }
 0x232   : > { %v548_v7 = vsub.f32 %v524_v45, %v537_v6 }
 0x234   : > { %v1101_v8 = vpop.eup %863  ;;  %v560_v9 = vmul.f32 1.442695, %v548_v7 }
 0x235   : > { %574 = vadd.xlane.f32.xlu2 %v1101_v8 }
 0x236   : > { %865 = vpow2.f32 %v560_v9 }
 0x239   : > { %v539_v10 = vpop.xlane.xlu2 %538 }
 0x23a   : > { %v549_v11 = vsub.f32 %v525_v48, %v539_v10 }
 0x23c   : > { %v1104_v12 = vpop.eup %865  ;;  %v562_v13 = vmul.f32 1.442695, %v549_v11 }
 0x23d   : > { %576 = vadd.xlane.f32.xlu0 %v1104_v12 }
 0x23e   : > { %867 = vpow2.f32 %v562_v13 }
 0x244   : > { %v1107_v14 = vpop.eup %867 }
 0x245   : > { %578 = vadd.xlane.f32.xlu1 %v1107_v14 }
 0x247   : > { %v541_v15 = vpop.xlane.xlu0 %540 }
 0x248   : > { %v550_v16 = vsub.f32 %v526_v51, %v541_v15 }
 0x24a   : > { %v564_v17 = vmul.f32 1.442695, %v550_v16 }
 0x24c   : > { %869 = vpow2.f32 %v564_v17 }
 0x24f   : > { %v543_v18 = vpop.xlane.xlu1 %542 }
 0x250   : > { %v551_v19 = vsub.f32 %v527_v54, %v543_v18 }
 0x252   : > { %v1110_v20 = vpop.eup %869  ;;  %v566_v21 = vmul.f32 1.442695, %v551_v19 }
 0x253   : > { %580 = vadd.xlane.f32.xlu2 %v1110_v20 }
 0x254   : > { %871 = vpow2.f32 %v566_v21 }
 0x25a   : > { %v1113_v22 = vpop.eup %871 }
 0x25b   : > { %582 = vadd.xlane.f32.xlu0 %v1113_v22 }
 0x290   : > { %v569_v23 = vpop.xlane.xlu2 %568 }
 0x291   : > { %873 = vrcp.f32 %v569_v23  ;;  %v595_v28 = vand.u32 2147483648, %v569_v23  ;;  %v593_v30 = vand.u32 2147483647, %v569_v23  ;;  %vm589_vm3 = vweird.f32 %v569_v23 }
 0x293   : > { %v596_v33 = vor.u32 1.1754944e-38, %v595_v28  ;;  %vm594_vm5 = vcmp.eq.f32.partialorder %v593_v30, 8.507059e+37 }
 0x297   : > { %v874_v24 = vpop.eup %873 }
 0x298   : > { %v585_v25 = vmul.f32 %v874_v24, %v569_v23  ;;  %v571_v26 = vpop.xlane.xlu0 %570  ;;  %vm590_vm2 = vweird.f32 %v874_v24 }
 0x299   : > { %875 = vrcp.f32 %v571_v26  ;;  %vm591_vm4 = vmor %vm589_vm3, %vm590_vm2  ;;  %v609_v40 = vand.u32 2147483648, %v571_v26  ;;  %v607_v42 = vand.u32 2147483647, %v571_v26  ;;  %vm603_vm7 = vweird.f32 %v571_v26 }
 0x29a   : > { %v586_v27 = vsub.f32 1.0, %v585_v25 }
 0x29b   : > { %v610_v45 = vor.u32 1.1754944e-38, %v609_v40  ;;  %vm608_vm9 = vcmp.eq.f32.partialorder %v607_v42, 8.507059e+37 }
 0x29c   : > { %v587_v29 = vmul.f32 %v874_v24, %v586_v27 }
 0x29e   : > { %v588_v31 = vadd.f32 %v874_v24, %v587_v29 }
 0x29f   : > { %v876_v32 = vpop.eup %875 }
 0x2a0   : > { %v592_v34 = vsel %vm591_vm4, %v874_v24, %v588_v31  ;;  %v599_v35 = vmul.f32 %v876_v32, %v571_v26  ;;  %v573_v36 = vpop.xlane.xlu1 %572  ;;  %vm604_vm6 = vweird.f32 %v876_v32 }
 0x2a1   : > { %v597_v37 = vsel %vm594_vm5, %v596_v33, %v592_v34  ;;  %877 = vrcp.f32 %v573_v36  ;;  %vm605_vm8 = vmor %vm603_vm7, %vm604_vm6  ;;  %v623_v52 = vand.u32 2147483648, %v573_v36  ;;  %v621_v54 = vand.u32 2147483647, %v573_v36 }
 0x2a2   : > { %v696_v38 = vmul.f32 %v1092_v60, %v597_v37  ;;  %v600_v39 = vsub.f32 1.0, %v599_v35  ;;  %vm617_vm11 = vweird.f32 %v573_v36 }
 0x2a3   : > { %v624_v57 = vor.u32 1.1754944e-38, %v623_v52  ;;  %vm622_vm13 = vcmp.eq.f32.partialorder %v621_v54, 8.507059e+37 }
 0x2a4   : > { %704 = vst [vmem:[%s1121_s20] sm:$0xff] %v696_v38  ;;  %v601_v41 = vmul.f32 %v876_v32, %v600_v39 }
 0x2a6   : > { %v602_v43 = vadd.f32 %v876_v32, %v601_v41 }
 0x2a7   : > { %v878_v44 = vpop.eup %877 }
 0x2a8   : > { %v606_v46 = vsel %vm605_vm8, %v876_v32, %v602_v43  ;;  %v613_v47 = vmul.f32 %v878_v44, %v573_v36  ;;  %v575_v48 = vpop.xlane.xlu2 %574  ;;  %vm618_vm10 = vweird.f32 %v878_v44 }
 0x2a9   : > { %v611_v49 = vsel %vm608_vm9, %v610_v45, %v606_v46  ;;  %879 = vrcp.f32 %v575_v48  ;;  %vm619_vm12 = vmor %vm617_vm11, %vm618_vm10  ;;  %v635_v2 = vand.u32 2147483647, %v575_v48  ;;  %vm631_vm15 = vweird.f32 %v575_v48 }
 0x2aa   : > { %v697_v50 = vmul.f32 %v1095_v0, %v611_v49  ;;  %v614_v51 = vsub.f32 1.0, %v613_v47  ;;  %v637_v0 = vand.u32 2147483648, %v575_v48 }
 0x2ab   : > { %vm636_vm1 = vcmp.eq.f32.partialorder %v635_v2, 8.507059e+37 }
 0x2ac   : > { %705 = vst [vmem:[%s1121_s20 + $0x8] sm:$0xff] %v697_v50  ;;  %v615_v53 = vmul.f32 %v878_v44, %v614_v51  ;;  %v638_v6 = vor.u32 1.1754944e-38, %v637_v0 }
 0x2ae   : > { %v616_v55 = vadd.f32 %v878_v44, %v615_v53 }
 0x2af   : > { %v880_v56 = vpop.eup %879 }
 0x2b0   : > { %v620_v58 = vsel %vm619_vm12, %v878_v44, %v616_v55  ;;  %v627_v59 = vmul.f32 %v880_v56, %v575_v48  ;;  %v577_v60 = vpop.xlane.xlu0 %576  ;;  %vm632_vm14 = vweird.f32 %v880_v56 }
 0x2b1   : > { %v625_v61 = vsel %vm622_vm13, %v624_v57, %v620_v58  ;;  %881 = vrcp.f32 %v577_v60  ;;  %vm633_vm0 = vmor %vm631_vm15, %vm632_vm14  ;;  %v651_v15 = vand.u32 2147483648, %v577_v60  ;;  %v649_v17 = vand.u32 2147483647, %v577_v60 }
 0x2b2   : > { %v698_v62 = vmul.f32 %v1098_v4, %v625_v61  ;;  %v628_v63 = vsub.f32 1.0, %v627_v59  ;;  %vm645_vm3 = vweird.f32 %v577_v60 }
 0x2b3   : > { %v652_v21 = vor.u32 1.1754944e-38, %v651_v15  ;;  %vm650_vm5 = vcmp.eq.f32.partialorder %v649_v17, 8.507059e+37 }
 0x2b4   : > { %706 = vst [vmem:[%s1121_s20 + $0x10] sm:$0xff] %v698_v62  ;;  %v629_v1 = vmul.f32 %v880_v56, %v628_v63 }
 0x2b6   : > { %v630_v3 = vadd.f32 %v880_v56, %v629_v1 }
 0x2b7   : > { %v882_v5 = vpop.eup %881 }
 0x2b8   : > { %v634_v7 = vsel %vm633_vm0, %v880_v56, %v630_v3  ;;  %v641_v9 = vmul.f32 %v882_v5, %v577_v60  ;;  %v579_v10 = vpop.xlane.xlu1 %578  ;;  %vm646_vm2 = vweird.f32 %v882_v5 }
 0x2b9   : > { %v639_v11 = vsel %vm636_vm1, %v638_v6, %v634_v7  ;;  %883 = vrcp.f32 %v579_v10  ;;  %vm647_vm4 = vmor %vm645_vm3, %vm646_vm2  ;;  %v663_v29 = vand.u32 2147483647, %v579_v10  ;;  %vm659_vm7 = vweird.f32 %v579_v10 }
 0x2ba   : > { %v699_v4 = vmul.f32 %v1101_v8, %v639_v11  ;;  %v642_v13 = vsub.f32 1.0, %v641_v9  ;;  %v665_v8 = vand.u32 2147483648, %v579_v10 }
 0x2bb   : > { %vm664_vm9 = vcmp.eq.f32.partialorder %v663_v29, 8.507059e+37 }
 0x2bc   : > { %707 = vst [vmem:[%s1121_s20 + $0x18] sm:$0xff] %v699_v4  ;;  %v643_v16 = vmul.f32 %v882_v5, %v642_v13  ;;  %v666_v32 = vor.u32 1.1754944e-38, %v665_v8 }
 0x2be   : > { %v644_v18 = vadd.f32 %v882_v5, %v643_v16 }
 0x2bf   : > { %v884_v19 = vpop.eup %883 }
 0x2c0   : > { %v648_v23 = vsel %vm647_vm4, %v882_v5, %v644_v18  ;;  %v655_v24 = vmul.f32 %v884_v19, %v579_v10  ;;  %vm660_vm6 = vweird.f32 %v884_v19 }
 0x2c1   : > { %v653_v25 = vsel %vm650_vm5, %v652_v21, %v648_v23  ;;  %vm661_vm8 = vmor %vm659_vm7, %vm660_vm6 }
 0x2c2   : > { %v700_v26 = vmul.f32 %v1104_v12, %v653_v25  ;;  %v656_v27 = vsub.f32 1.0, %v655_v24 }
 0x2c4   : > { %708 = vst [vmem:[%s1121_s20 + $0x20] sm:$0xff] %v700_v26  ;;  %v657_v28 = vmul.f32 %v884_v19, %v656_v27 }
 0x2c6   : > { %v658_v30 = vadd.f32 %v884_v19, %v657_v28  ;;  %v581_v31 = vpop.xlane.xlu2 %580 }
 0x2c7   : > { %885 = vrcp.f32 %v581_v31  ;;  %v679_v39 = vand.u32 2147483648, %v581_v31  ;;  %v677_v41 = vand.u32 2147483647, %v581_v31  ;;  %vm673_vm11 = vweird.f32 %v581_v31 }
 0x2c8   : > { %v662_v33 = vsel %vm661_vm8, %v884_v19, %v658_v30 }
 0x2c9   : > { %v667_v34 = vsel %vm664_vm9, %v666_v32, %v662_v33  ;;  %v680_v44 = vor.u32 1.1754944e-38, %v679_v39  ;;  %vm678_vm13 = vcmp.eq.f32.partialorder %v677_v41, 8.507059e+37 }
 0x2ca   : > { %v701_v35 = vmul.f32 %v1107_v14, %v667_v34 }
 0x2cc   : > { %709 = vst [vmem:[%s1121_s20 + $0x28] sm:$0xff] %v701_v35 }
 0x2cd   : > { %v886_v12 = vpop.eup %885 }
 0x2ce   : > { %v669_v36 = vmul.f32 %v886_v12, %v581_v31  ;;  %v583_v37 = vpop.xlane.xlu0 %582  ;;  %vm674_vm10 = vweird.f32 %v886_v12 }
 0x2cf   : > { %887 = vrcp.f32 %v583_v37  ;;  %vm675_vm12 = vmor %vm673_vm11, %vm674_vm10  ;;  %v693_v49 = vand.u32 2147483648, %v583_v37  ;;  %v691_v51 = vand.u32 2147483647, %v583_v37  ;;  %vm687_vm15 = vweird.f32 %v583_v37 }
 0x2d0   : > { %v670_v38 = vsub.f32 1.0, %v669_v36 }
 0x2d1   : > { %v694_v53 = vor.u32 1.1754944e-38, %v693_v49  ;;  %vm692_vm1 = vcmp.eq.f32.partialorder %v691_v51, 8.507059e+37 }
 0x2d2   : > { %v671_v40 = vmul.f32 %v886_v12, %v670_v38 }
 0x2d4   : > { %v672_v42 = vadd.f32 %v886_v12, %v671_v40 }
 0x2d5   : > { %v888_v43 = vpop.eup %887 }
 0x2d6   : > { %v676_v45 = vsel %vm675_vm12, %v886_v12, %v672_v42  ;;  %v683_v46 = vmul.f32 %v888_v43, %v583_v37  ;;  %vm688_vm14 = vweird.f32 %v888_v43 }
 0x2d7   : > { %v681_v14 = vsel %vm678_vm13, %v680_v44, %v676_v45  ;;  %vm689_vm0 = vmor %vm687_vm15, %vm688_vm14 }
 0x2d8   : > { %v702_v47 = vmul.f32 %v1110_v20, %v681_v14  ;;  %v684_v48 = vsub.f32 1.0, %v683_v46 }
 0x2da   : > { %710 = vst [vmem:[%s1121_s20 + $0x30] sm:$0xff] %v702_v47  ;;  %v685_v50 = vmul.f32 %v888_v43, %v684_v48 }
 0x2dc   : > { %v686_v52 = vadd.f32 %v888_v43, %v685_v50 }
 0x2de   : > { %v690_v54 = vsel %vm689_vm0, %v888_v43, %v686_v52 }
 0x2df   : > { %v695_v55 = vsel %vm692_vm1, %v694_v53, %v690_v54 }
 0x2e0   : > { %v703_v56 = vmul.f32 %v1113_v22, %v695_v55 }
 0x2e2   : > { %711 = vst [vmem:[%s1121_s20 + $0x38] sm:$0xff] %v703_v56 }
 0x2e3 PF: > { %s18_s24 = sadd.s32 1, %s929_s24  }
 0x2e4   : > { %p15_p7 = scmp.ge.s32.totalorder %s18_s24, 4  }
 0x2e6   :  { %17 = sbr.rel (!%p15_p7) target bundleno = 1 (0x1), region = 83 }
 0x2eb   :  { %734 = vsyncpa [#allocation3], 1 }
 0x2ec   :  { %736 = vsyncpa [#allocation3 + $0x1], 1 }

</bundles_post_ra>
